<compile_context>
chip_gen: v6e
topology: v6e:2x2x1
jax: 0.10.0
libtpu: 0.0.40
codegen_flags: <defaults>
</compile_context>

<pallas_src>
from dataclasses import dataclass
from typing import NamedTuple, Optional, Tuple

import numpy as np
import jax
import jax.numpy as jnp
from jax.experimental import pallas as pl
from jax.experimental.pallas import tpu as pltpu


def _ceil_to(n: int, m: int) -> int:
    return (n + m - 1) // m * m


@dataclass(frozen=True)
class MLPConfig:
    input_size: int
    hidden_size: int
    num_layers: int                     # >= 1: input layer + (num_layers-1) hidden + output
    output_size: int
    activation: Optional[str] = "relu"  # None -> identity (matches the module); str -> ReLU
    extend_states: bool = False
    input_normalizer: bool = False
    output_normalizer: bool = False

    def layer_dims(self):
        dims = [(self.input_size, self.hidden_size)]
        dims += [(self.hidden_size, self.hidden_size)] * (self.num_layers - 1)
        dims += [(self.hidden_size, self.output_size)]
        return dims

    @property
    def total_output_size(self):
        return self.output_size + (self.input_size if self.extend_states else 0)


class PackedMLP(NamedTuple):
    slab: jax.Array                                  # [rows, 128k] f32 param slab
    layer_meta: Tuple[Tuple[int, int, int], ...]     # (row_offset, in_dim, out_dim)
    x_aff_off: Optional[int]                         # affine for extend_states x-slice


def init_params(key, cfg: MLPConfig):
    """Random parameters in PyTorch nn.Linear layout (W: [out, in], b: [out])."""
    dims = cfg.layer_dims()
    keys = jax.random.split(key, 2 * len(dims))
    weights = []
    for i, (din, dout) in enumerate(dims):
        w = (0.1 * jax.random.normal(keys[2 * i], (dout, din))).astype(jnp.float32)
        b = (0.1 * jax.random.normal(keys[2 * i + 1], (dout,))).astype(jnp.float32)
        weights.append((w, b))
    params = {"weights": weights}
    if cfg.input_normalizer:
        params["x_min"] = jnp.full((cfg.input_size,), -2.0, jnp.float32)
        params["x_max"] = jnp.full((cfg.input_size,), 2.0, jnp.float32)
    if cfg.output_normalizer:
        f_tot = cfg.total_output_size
        params["y_min"] = jnp.linspace(-1.0, -0.5, f_tot).astype(jnp.float32)
        params["y_max"] = jnp.linspace(0.5, 1.0, f_tot).astype(jnp.float32)
    return params


def pack_params(params, cfg: MLPConfig) -> PackedMLP:
    """Fold normalizers into the layer weights and pack everything into one slab.

    Folding (exact algebra, done in f64 host-side):
      x_norm = x*s + t            s = 1/(x_max-x_min), t = -x_min*s
      layer0:  W0' = W0 * s[col], b0' = W0 @ t + b0
      last:    WL' = WL * r_y[row], bL' = bL * r_y + m_y   (r,m = output de-norm)
      extend_states x-slice:  x*(s*r_x) + (t*r_x + m_x)
    """
    dims = cfg.layer_dims()
    f_in, f_tot = cfg.input_size, cfg.total_output_size

    if cfg.input_normalizer:
        x_min = np.asarray(params["x_min"], np.float64).reshape(-1)
        x_max = np.asarray(params["x_max"], np.float64).reshape(-1)
        s = 1.0 / (x_max - x_min)
        t = -x_min * s
    else:
        s = np.ones((f_in,), np.float64)
        t = np.zeros((f_in,), np.float64)

    if cfg.output_normalizer:
        y_min = np.asarray(params["y_min"], np.float64).reshape(-1)
        y_max = np.asarray(params["y_max"], np.float64).reshape(-1)
        rng = y_max - y_min
    else:
        rng = np.ones((f_tot,), np.float64)
        y_min = np.zeros((f_tot,), np.float64)

    if cfg.extend_states:
        r_x, m_x = rng[:f_in], y_min[:f_in]
        r_y, m_y = rng[f_in:], y_min[f_in:]
    else:
        r_x, m_x = None, None
        r_y, m_y = rng, y_min

    n = len(dims)
    folded = []
    for i, ((din, dout), (w, b)) in enumerate(zip(dims, params["weights"])):
        w = np.asarray(w, np.float64)
        b = np.asarray(b, np.float64)
        if i == 0:                               # fold input normalizer
            b = w @ t + b
            w = w * s[None, :]
        if i == n - 1:                           # fold output de-normalizer
            w = w * r_y[:, None]
            b = b * r_y + m_y
        folded.append((w.astype(np.float32), b.astype(np.float32)))

    pad_c = _ceil_to(max(max(din + 1 for din, _ in dims), 2), 128)

    layer_meta = []
    r = 0
    for (din, dout) in dims:
        layer_meta.append((r, din, dout))
        r += _ceil_to(dout, 8)                   # keep each block sublane-aligned

    x_aff_off = None
    if cfg.extend_states and (cfg.input_normalizer or cfg.output_normalizer):
        x_aff_off = r
        r += _ceil_to(f_in, 8)

    rows = max(_ceil_to(r, 8), 8)
    slab = np.zeros((rows, pad_c), np.float32)
    for (off, din, dout), (w, b) in zip(layer_meta, folded):
        slab[off:off + dout, 0:din] = w
        slab[off:off + dout, din] = b
    if x_aff_off is not None:
        slab[x_aff_off:x_aff_off + f_in, 0] = (s * r_x).astype(np.float32)
        slab[x_aff_off:x_aff_off + f_in, 1] = (t * r_x + m_x).astype(np.float32)

    return PackedMLP(jnp.asarray(slab), tuple(layer_meta), x_aff_off)


def _make_mlp_kernel(cfg: MLPConfig, packed: PackedMLP):
    f_in = cfg.input_size
    f_out = cfg.output_size
    relu = cfg.activation is not None
    layer_meta = packed.layer_meta
    n_layers = len(layer_meta)
    x_aff = packed.x_aff_off
    extend = cfg.extend_states

    def kernel(x_ref, slab_ref, out_ref):
        # x_ref: [bm, f_in]. One in-kernel transpose (XLU slot is otherwise idle)
        # puts the batch on lanes for the whole fused layer stack.
        x_t = jnp.transpose(x_ref[...], (1, 0))                  # [f_in, bm]

        h = x_t
        for idx, (off, din, dout) in enumerate(layer_meta):      # fused Linear stack
            w = slab_ref[off:off + dout, 0:din]
            b = slab_ref[off:off + dout, din:din + 1]
            # Default MXU precision (HIGHEST dropped per perf review).
            h = jnp.dot(w, h, preferred_element_type=jnp.float32) + b
            if relu and idx < n_layers - 1:                      # act after all but output layer
                h = jnp.maximum(h, 0.0)

        if extend:
            # Two direct row-range stores instead of jnp.concatenate.
            if x_aff is not None:
                a = slab_ref[x_aff:x_aff + f_in, 0:1]
                c = slab_ref[x_aff:x_aff + f_in, 1:2]
                x_part = x_t * a + c
            else:
                x_part = x_t
            out_ref[0:f_in, :] = x_part.astype(out_ref.dtype)
            out_ref[f_in:f_in + f_out, :] = h.astype(out_ref.dtype)
        else:
            out_ref[...] = h.astype(out_ref.dtype)

    return kernel


def _tile_plan(cfg: MLPConfig, B: int, slab_bytes: int):
    """Pick the batch lane-tile from a per-generation VMEM budget."""
    f_in, f_tot, hid = cfg.input_size, cfg.total_output_size, cfg.hidden_size
    # Per-lane VMEM bytes: double-buffered x block + double-buffered y block
    # + headroom for the f32 activations of the layer stack.
    per_lane = 4 * (2 * f_in + 2 * f_tot + 4 * max(hid, f_in, f_tot))
    try:
        vmem_cap = int(pltpu.get_tpu_info().vmem_capacity_bytes)
    except Exception:
        vmem_cap = 64 << 20                       # conservative: v7x per-TC physical VMEM
    budget = (vmem_cap // 2) - slab_bytes - (2 << 20)
    bm_cap = max(128, min(8192, max(0, budget) // per_lane // 128 * 128))

    if B < 256:
        bm = _ceil_to(B, 128)                     # one lane-dense step
    else:
        # At least two balanced "parallel" steps so v7x megacore splits the batch;
        # otherwise as large as the VMEM budget allows (amortizes ~0.35us/step).
        bm = min(bm_cap, _ceil_to((B + 1) // 2, 128))
    b_pad = _ceil_to(B, bm)
    vmem_limit = int(min(vmem_cap,
                         max(32 << 20, per_lane * bm + 2 * slab_bytes + (4 << 20))))
    return bm, b_pad, vmem_limit


def mlp_forward(x, packed: PackedMLP, cfg: MLPConfig):
    """Fused Pallas MLP forward. x: [B, ...] -> [B, total_output_size]."""
    B = x.shape[0]
    x2 = jnp.asarray(x, jnp.float32).reshape(B, -1)
    assert x2.shape[1] == cfg.input_size
    # TODO(synk): normalizers are folded per flattened feature; for >2-D inputs with
    # broadcast normalizer shapes the PyTorch normalize-then-reshape needs per-shape handling.
    f_in, f_tot = cfg.input_size, cfg.total_output_size

    slab = packed.slab
    bm, b_pad, vmem_limit = _tile_plan(cfg, B, int(slab.size) * 4)
    if b_pad != B:
        x2 = jnp.pad(x2, ((0, b_pad - B), (0, 0)))
    grid = (b_pad // bm,)

    # Constant parameter slab: no double buffering (index_map is always (0,0)).
    try:
        slab_spec = pl.BlockSpec(slab.shape, lambda i: (0, 0),
                                 pipeline_mode=pl.Buffered(1))
    except TypeError:
        slab_spec = pl.BlockSpec(slab.shape, lambda i: (0, 0))

    out_t = pl.pallas_call(
        _make_mlp_kernel(cfg, packed),
        out_shape=jax.ShapeDtypeStruct((f_tot, b_pad), jnp.float32),
        grid=grid,
        in_specs=[
            pl.BlockSpec((bm, f_in), lambda i: (i, 0)),   # batch tiles, no host transpose
            slab_spec,
        ],
        out_specs=pl.BlockSpec((f_tot, bm), lambda i: (0, i)),   # lane-dense output
        compiler_params=pltpu.CompilerParams(
            dimension_semantics=("parallel",),            # shard batch tiles across TCs on v7x
            vmem_limit_bytes=vmem_limit,
        ),
    )(x2, slab)

    return out_t[:, :B].T                                 # back to [B, f_tot]


def reference_forward(x, params, cfg: MLPConfig):
    """Plain-JAX transcription of the PyTorch MLP.forward (default MXU precision)."""
    x = jnp.asarray(x, jnp.float32)
    if cfg.input_normalizer:
        x = (x - params["x_min"]) / (params["x_max"] - params["x_min"])
    x = x.reshape(x.shape[0], -1)
    act = (lambda v: jnp.maximum(v, 0.0)) if cfg.activation is not None else (lambda v: v)

    weights = params["weights"]
    h = x
    for w, b in weights[:-1]:
        h = act(jnp.dot(h, w.T) + b)
    w, b = weights[-1]
    y = jnp.dot(h, w.T) + b
    if cfg.extend_states:
        y = jnp.concatenate([x, y], axis=1)
    if cfg.output_normalizer:
        y = y * (params["y_max"] - params["y_min"]) + params["y_min"]
    return y


if __name__ == "__main__":
    cfg = MLPConfig(input_size=4, hidden_size=32, num_layers=2, output_size=3,
                    activation="relu", extend_states=True,
                    input_normalizer=True, output_normalizer=True)

    key = jax.random.PRNGKey(0)
    k_param, k_x = jax.random.split(key)
    params = init_params(k_param, cfg)
    packed = pack_params(params, cfg)

    B = 256                                               # >= 256 -> two parallel lane tiles
    x = jax.random.normal(k_x, (B, cfg.input_size), dtype=jnp.float32)

    y = mlp_forward(x, packed, cfg)
    jax.block_until_ready(y)

    y_ref = reference_forward(x, params, cfg)
    err = float(jnp.max(jnp.abs(y - y_ref)))
    assert y.shape == (B, cfg.total_output_size)
    # Default (bf16-class) MXU precision in both paths + host-side normalizer folding
    # -> tolerance sized for bf16-class error.
    assert jnp.allclose(y, y_ref, atol=1e-2, rtol=1e-2), f"max abs err = {err}"

    print("KERNEL_OK")
</pallas_src>

<mosaic_0001>
module attributes {stable_mosaic.version = 11 : i64} {
  func.func @kernel(%arg0: i32, %arg1: memref<128x4xf32, #tpu.memory_space<vmem>>, %arg2: memref<80x128xf32, #tpu.memory_space<vmem>>, %arg3: memref<7x128xf32, #tpu.memory_space<vmem>>) attributes {dimension_semantics = [#tpu.dimension_semantics<parallel>], iteration_bounds = array<i64: 2>, scalar_prefetch = 0 : i64, scratch_operands = 0 : i64, tpu.core_type = #tpu.core_type<tc>, window_params = [{transform_indices = @transform_0, window_bounds = array<i64: 128, 4>}, {pipeline_mode = #tpu.pipeline_mode<synchronous>, transform_indices = @transform_1, window_bounds = array<i64: 80, 128>}, {transform_indices = @transform_2, window_bounds = array<i64: 7, 128>}]} {
    %c0 = arith.constant 0 : index
    %c0_0 = arith.constant 0 : index
    %0 = vector.load %arg1[%c0, %c0_0] : memref<128x4xf32, #tpu.memory_space<vmem>>, vector<128x4xf32>
    %1 = tpu.transpose %0, [1, 0] : vector<128x4xf32> -> vector<4x128xf32>
    %c0_1 = arith.constant 0 : index
    %c0_2 = arith.constant 0 : index
    %2 = vector.load %arg2[%c0_1, %c0_2] : memref<80x128xf32, #tpu.memory_space<vmem>>, vector<32x4xf32>
    %c0_3 = arith.constant 0 : index
    %c4 = arith.constant 4 : index
    %3 = vector.load %arg2[%c0_3, %c4] : memref<80x128xf32, #tpu.memory_space<vmem>>, vector<32x1xf32>
    %cst = arith.constant dense<0.000000e+00> : vector<32x128xf32>
    %4 = tpu.matmul %2, %1, %cst {dimension_numbers = #tpu.dot_dimension_numbers<[1], [0], [0], [1], [0, 0, 1, 1], [], []>} : vector<32x4xf32>, vector<4x128xf32>, vector<32x128xf32> -> vector<32x128xf32>
    %5 = vector.broadcast %3 : vector<32x1xf32> to vector<32x128xf32>
    %6 = arith.addf %4, %5 : vector<32x128xf32>
    %cst_4 = arith.constant 0.000000e+00 : f32
    %7 = vector.broadcast %cst_4 : f32 to vector<32x128xf32>
    %8 = arith.maximumf %6, %7 : vector<32x128xf32>
    %c32 = arith.constant 32 : index
    %c0_5 = arith.constant 0 : index
    %9 = vector.load %arg2[%c32, %c0_5] : memref<80x128xf32, #tpu.memory_space<vmem>>, vector<32x32xf32>
    %c32_6 = arith.constant 32 : index
    %c32_7 = arith.constant 32 : index
    %10 = vector.load %arg2[%c32_6, %c32_7] : memref<80x128xf32, #tpu.memory_space<vmem>>, vector<32x1xf32>
    %cst_8 = arith.constant dense<0.000000e+00> : vector<32x128xf32>
    %11 = tpu.matmul %9, %8, %cst_8 {dimension_numbers = #tpu.dot_dimension_numbers<[1], [0], [0], [1], [0, 0, 1, 1], [], []>} : vector<32x32xf32>, vector<32x128xf32>, vector<32x128xf32> -> vector<32x128xf32>
    %12 = vector.broadcast %10 : vector<32x1xf32> to vector<32x128xf32>
    %13 = arith.addf %11, %12 : vector<32x128xf32>
    %cst_9 = arith.constant 0.000000e+00 : f32
    %14 = vector.broadcast %cst_9 : f32 to vector<32x128xf32>
    %15 = arith.maximumf %13, %14 : vector<32x128xf32>
    %c64 = arith.constant 64 : index
    %c0_10 = arith.constant 0 : index
    %16 = vector.load %arg2[%c64, %c0_10] : memref<80x128xf32, #tpu.memory_space<vmem>>, vector<3x32xf32>
    %c64_11 = arith.constant 64 : index
    %c32_12 = arith.constant 32 : index
    %17 = vector.load %arg2[%c64_11, %c32_12] : memref<80x128xf32, #tpu.memory_space<vmem>>, vector<3x1xf32>
    %cst_13 = arith.constant dense<0.000000e+00> : vector<3x128xf32>
    %18 = tpu.matmul %16, %15, %cst_13 {dimension_numbers = #tpu.dot_dimension_numbers<[1], [0], [0], [1], [0, 0, 1, 1], [], []>} : vector<3x32xf32>, vector<32x128xf32>, vector<3x128xf32> -> vector<3x128xf32>
    %19 = vector.broadcast %17 : vector<3x1xf32> to vector<3x128xf32>
    %20 = arith.addf %18, %19 : vector<3x128xf32>
    %c72 = arith.constant 72 : index
    %c0_14 = arith.constant 0 : index
    %21 = vector.load %arg2[%c72, %c0_14] : memref<80x128xf32, #tpu.memory_space<vmem>>, vector<4x1xf32>
    %c72_15 = arith.constant 72 : index
    %c1 = arith.constant 1 : index
    %22 = vector.load %arg2[%c72_15, %c1] : memref<80x128xf32, #tpu.memory_space<vmem>>, vector<4x1xf32>
    %23 = vector.broadcast %21 : vector<4x1xf32> to vector<4x128xf32>
    %24 = arith.mulf %1, %23 : vector<4x128xf32>
    %25 = vector.broadcast %22 : vector<4x1xf32> to vector<4x128xf32>
    %26 = arith.addf %24, %25 : vector<4x128xf32>
    %c0_16 = arith.constant 0 : index
    %c0_17 = arith.constant 0 : index
    %27 = vector.load %arg3[%c0_16, %c0_17] : memref<7x128xf32, #tpu.memory_space<vmem>>, vector<4x128xf32>
    tpu.vector_store %arg3[%c0_16, %c0_17], %26 {strides = array<i32>} : memref<7x128xf32, #tpu.memory_space<vmem>>, vector<4x128xf32>,
    %c4_18 = arith.constant 4 : index
    %c0_19 = arith.constant 0 : index
    %28 = vector.load %arg3[%c4_18, %c0_19] : memref<7x128xf32, #tpu.memory_space<vmem>>, vector<3x128xf32>
    tpu.vector_store %arg3[%c4_18, %c0_19], %20 {strides = array<i32>} : memref<7x128xf32, #tpu.memory_space<vmem>>, vector<3x128xf32>,
    return
  }
  func.func @transform_0(%arg0: i32) -> (i32, i32) {
    %c0_i32 = arith.constant 0 : i32
    %c0_i32_0 = arith.constant 0 : i32
    return %arg0, %c0_i32 : i32, i32
  }
  func.func @transform_1(%arg0: i32) -> (i32, i32) {
    %c0_i32 = arith.constant 0 : i32
    %c0_i32_0 = arith.constant 0 : i32
    %c0_i32_1 = arith.constant 0 : i32
    return %c0_i32, %c0_i32_0 : i32, i32
  }
  func.func @transform_2(%arg0: i32) -> (i32, i32) {
    %c0_i32 = arith.constant 0 : i32
    %c0_i32_0 = arith.constant 0 : i32
    return %c0_i32, %arg0 : i32, i32
  }
}

</mosaic_0001>

<bundles_post_ra>
// kernel: tpu_custom_call.1
= control target key start
LH: loop header
LB: loop body
LE: loop exit
PB: predicated region body
PF: predicated region fallthrough
CT: control target
= control target key end

     0   :  { %7 = vsyncpa [#allocation3], 0  ;;  %s994_s0 = inlined_call_operand.vmem [shape: f32[256,4], index: 0, kind: input, shape index: {}]   ;;  %s995_s1 = inlined_call_operand.vmem [shape: f32[80,128], index: 1, kind: input, shape index: {}]   ;;  %s996_s2 = inlined_call_operand.hbm [shape: f32[7,256], index: 2, kind: output, shape index: {}]  }
   0x1   :  { %9 = vsyncpa [#allocation3 + $0x1], 0  ;;  %s812_s9 = smov 0   ;;  %s814_s10 = smov 0  }
   0x2   :  { %s816_s11 = smov 0   ;;  %s818_s12 = smov 0  }
   0x3 LB: > { %s833_s13 = sadd.s32 4294967295, %s788_s12   ;;  %s605_s14 = sadd.s32 4294967294, %s788_s12   ;;  %s788_s12 = sphi %s818_s12, %s1002_s12   ;;  %s784_s11 = sphi %s816_s11, %s1001_s11   ;;  %s780_s10 = sphi %s814_s10, %s1000_s10   ;;  %s776_s9 = sphi %s812_s9, %s999_s9  }
   0x4   : > { %s837_s15 = sadd.s32 1, %s788_s12   ;;  %s69_s16 = sadd.s32 1, %s784_s11 }
   0x5   : > { %s66_s17 = ssub.s32 %s788_s12, %s837_s15  ;;  %p79_p0 = scmp.ne.s32.totalorder %s784_s11, %s780_s10 }
   0x6   : > { %p67_p1 = scmp.eq.s32.totalorder %s66_s17, 0  ;;  %p80_p2 = scmp.eq.s32.totalorder %s833_s13, 1 }
   0x7   : > { %p85_p3 = scmp.ne.s32.totalorder %s780_s10, %s776_s9  ;;  %p86_p4 = scmp.eq.s32.totalorder %s605_s14, 1 }
   0x8   : > { %s848_s18 = scalar_select %p67_p1, %s784_s11, %s69_s16  }
   0x9   : > { %p850_p5 = por %p80_p2, %p79_p0  ;;  %p854_p6 = por %p86_p4, %p85_p3 }
   0xa   : > { %p608_p7 = scmp.ge.s32.totalorder %s788_s12, 1  ;;  %p116_p8 = scmp.lt.s32.totalorder %s788_s12, 3 }
   0xc   : > { %p117_p9 = pnand %p608_p7, %p116_p8 }
   0xd   : > { %s610_s23 = sshll.u32 (!%p117_p9), %s833_s13, 4  ;;  %s135_s27 = sand.u32 (!%p117_p9), 1, %s780_s10  }
   0xe   : > { %120 = sbr.rel (%p117_p9) target bundleno = 775 (0x307), region = 28  ;;  %p139_p10 = scmp.lt.s32.totalorder (!%p117_p9), %s610_s23, 31 }
   0xf   : > { %s609_s28 = sshll.u32 (!%p117_p9), %s135_s27, 3  ;;  %s623_s30 = sshll.u32 (!%p117_p9), %s833_s13, 7 }
  0x10   : > { %s939_s29 = scalar_lea.vmem (!%p117_p9), [#allocation2], %s609_s28  ;;  %s956_s6 = scalar_lea.hbm (!%p117_p9), %s996_s2, %s623_s30 }
  0x11   : > { %s533_s7 = scalar_lea.sflag (!%p117_p9), [#allocation3], %s135_s27  ;;  %s796_s14 = smov (!%p117_p9), [#allocation2]  }
  0x12   : > { %s732_s13 = sshll.u32 (!%p117_p9), %s796_s14, 4  ;;  %s733_s13 = int_to_ptr.vmem [resolvable:$false] %s732_s13 }
  0x13   : > { %v863_v0 = vld [vmem:[%s995_s1 + $0x18] sm:$0xff]  ;;  %v790_v1 = vmov 4   ;;  %v870_v2 = vld [vmem:[%s995_s1 + $0x10] sm:$0xff]  ;;  %s1004_s23 = smov (!%p139_p10, %s610_s23), 31  ;;  %v192_v3 = vld [vmem:[%s995_s1] sm:$0xff]  ;;  %vm216_vm0 = vcmask 31744  }
  0x14   : > { %722 = vset.pattern.permute.xlu1 %v790_v1  ;;  %s611_s26 = sshll.u32 %s1004_s23, 3  ;;  %646 = vmatprep.mubr.msk.f32.mxu0 %vm216_vm0, %v192_v3  ;;  %v193_v5 = vld [vmem:[%s995_s1 + $0x8] sm:$0xff]  ;;  %v891_v8 = vld [vmem:[%s995_s1 + $0x38] sm:$0xff]  ;;  %v791_v10 = vmov 32   ;;  %v898_v11 = vld [vmem:[%s995_s1 + $0x30] sm:$0xff]  ;;  %v792_v19 = vmov 0  }
  0x15   : > { %213 = vperm.xlu1 %722, %v863_v0   ;;  %s879_s3 = scalar_lea.vmem %s994_s0, %s611_s26  ;;  %v905_v13 = vld [vmem:[%s995_s1 + $0x28] sm:$0xff]  ;;  %v318_v15 = vld [vmem:[%s995_s1 + $0x20] sm:$0xff]  ;;  %v793_v23 = vmov 1   ;;  %vm225_vm1 = vcmask 1043456   ;;  %vm342_vm2 = vcmask 261120   ;;  %v794_v56 = vmov 0.0  }
  0x16   : > { %v144_v4 = vld [vmem:[%s879_s3] sm:$0xff]  ;;  %v145_v6 = vld [vmem:[%s879_s3 + $0x8] sm:$0xff]  ;;  %v146_v7 = vld [vmem:[%s879_s3 + $0x10] sm:$0xff]  ;;  %660 = vmatprep.mubr.msk.f32.mxu1 %vm342_vm2, %v318_v15  ;;  %vm795_vm3 = vmmov 0   ;;  %s734_s16 = scalar_lea.vmem %s733_s13, 256 }
  0x17   : > { %160 = vxpose.xlu0.b32.start [1/16] (narrow) %v144_v4, 8  ;;  %v147_v9 = vld [vmem:[%s879_s3 + $0x18] sm:$0xff]  ;;  %v148_v12 = vld [vmem:[%s879_s3 + $0x20] sm:$0xff]  ;;  %v149_v14 = vld [vmem:[%s879_s3 + $0x28] sm:$0xff] }
  0x18   : > { %v150_v16 = vld [vmem:[%s879_s3 + $0x30] sm:$0xff]  ;;  %v518_v17 = vld [vmem:[%s995_s1 + $0x48] sm:$0xf]  ;;  %v151_v18 = vld [vmem:[%s879_s3 + $0x38] sm:$0xff] }
  0x19   : > { %208 = vperm.xlu1 %722, %v870_v2   ;;  %v152_v20 = vld [vmem:[%s879_s3 + $0x40] sm:$0xff]  ;;  %v153_v22 = vld [vmem:[%s879_s3 + $0x48] sm:$0xff]  ;;  %v154_v24 = vld [vmem:[%s879_s3 + $0x50] sm:$0xff] }
  0x1a   : > { %v921_v21 = vld [vmem:[%s995_s1 + $0x40] sm:$0x7]  ;;  %v155_v25 = vld [vmem:[%s879_s3 + $0x58] sm:$0xff]  ;;  %v157_v27 = vld [vmem:[%s879_s3 + $0x68] sm:$0xff] }
  0x1b   : > { %161 = vxpose.xlu0.b32.cont [2/16] (narrow) %v145_v6, 8  ;;  %v156_v26 = vld [vmem:[%s879_s3 + $0x60] sm:$0xff]  ;;  %v158_v28 = vld [vmem:[%s879_s3 + $0x70] sm:$0xff]  ;;  %v159_v29 = vld [vmem:[%s879_s3 + $0x78] sm:$0xff]  ;;  %s546_s3 = sshll.u32 %s939_s29, 4  ;;  %s547_s3 = int_to_ptr.vmem [resolvable:$true] %s546_s3 }
  0x1c   : > { %s728_s8 = scalar_lea.vmem %s547_s3, 128  ;;  %p735_p0 = scmp.lt.s32.totalorder %s547_s3, %s733_s13 }
  0x1d   : > { %203 = vperm.xlu1 %722, %v193_v5   ;;  %p729_p11 = scmp.ne.s32.totalorder %s547_s3, %s728_s8  ;;  %p736_p1 = scmp.lt.s32.totalorder %s734_s16, %s728_s8 }
  0x1f   : > { %162 = vxpose.xlu0.b32.cont [3/16] (narrow) %v146_v7, 8  ;;  %p730_p12 = pnand %p729_p11, %p850_p5  ;;  %p737_p2 = por %p736_p1, %p735_p0 }
  0x21   : > { %198 = vperm.xlu1 %722, %v192_v3   ;;  %p731_p13 = pneg %p730_p12 }
  0x23   : > { %163 = vxpose.xlu0.b32.cont [4/16] (narrow) %v147_v9, 8  ;;  %p738_p3 = pnand %p737_p2, %p731_p13 }
  0x25   : > { %723 = vset.pattern.permute.xlu1 %v791_v10 }
  0x26   : > { %339 = vperm.xlu1 %723, %v891_v8  }
  0x27   : > { %164 = vxpose.xlu0.b32.cont [5/16] (narrow) %v148_v12, 8 }
  0x2a   : > { %334 = vperm.xlu1 %723, %v898_v11  }
  0x2b   : > { %165 = vxpose.xlu0.b32.cont [6/16] (narrow) %v149_v14, 8 }
  0x2e   : > { %329 = vperm.xlu1 %723, %v905_v13  }
  0x2f   : > { %166 = vxpose.xlu0.b32.cont [7/16] (narrow) %v150_v16, 8 }
  0x32   : > { %324 = vperm.xlu1 %723, %v318_v15  }
  0x33   : > { %167 = vxpose.xlu0.b32.cont [8/16] (narrow) %v151_v18, 8 }
  0x36   : > { %724 = vset.pattern.permute.xlu1 %v792_v19 }
  0x37   : > { %521 = vperm.xlu1 %724, %v518_v17   ;;  %168 = vxpose.xlu0.b32.cont [9/16] (narrow) %v152_v20, 8 }
  0x3b   : > { %725 = vset.pattern.permute.xlu1 %v791_v10  ;;  %169 = vxpose.xlu0.b32.cont [10/16] (narrow) %v153_v22, 8 }
  0x3c   : > { %443 = vperm.xlu1 %725, %v921_v21  }
  0x3f   : > { %170 = vxpose.xlu0.b32.cont [11/16] (narrow) %v154_v24, 8 }
  0x40   : > { %726 = vset.pattern.permute.xlu1 %v793_v23 }
  0x41   : > { %526 = vperm.xlu1 %726, %v518_v17  }
  0x43   : > { %171 = vxpose.xlu0.b32.cont [12/16] (narrow) %v155_v25, 8 }
  0x47   : > { %172 = vxpose.xlu0.b32.cont [13/16] (narrow) %v156_v26, 8 }
  0x4b   : > { %173 = vxpose.xlu0.b32.cont [14/16] (narrow) %v157_v27, 8 }
  0x4f   : > { %174 = vxpose.xlu0.b32.cont [15/16] (narrow) %v158_v28, 8 }
  0x53   : > { %175 = vxpose.xlu0.b32.end [16/16] (narrow) %v159_v29, 8 }
  0x7c   : > { %727 = vset.pattern.permute.xlu0 %v793_v23 }
  0x90   : > { %v214_v30 = vpop.permute.xlu1 %213 }
  0x93   : > { %v176_v32 = vpop.trf.xlu0 }
  0x94   : > { %v209_v31 = vpop.permute.xlu1 %208  ;;  %644 = vmatprep.subr.msk.mxu0 %vm225_vm1, %v176_v32 }
  0x95   : > { %645 = vmatpush3.msk.msra.mxu0 %vm225_vm1, %v176_v32 }
  0x96   : > { %647 = vmatmul.mubr.msk.f32.vlgmr.msra.gmra.mxu0 %vm216_vm0, %v193_v5  ;;  %666 = vmatprep.subr.mxu0 %v794_v56 }
  0x97   : > { %649 = vmatprep.mubr.msk.f32.mxu0 %vm216_vm0, %v870_v2 }
  0x98   : > { %v204_v33 = vpop.permute.xlu1 %203 }
  0x9a   : > { %650 = vmatmul.mubr.msk.f32.gmra.mxu0 %vm216_vm0, %v863_v0 }
  0x9b   : > { %674 = vmatprep.mubr.msk.f32.mxu0 %vm795_vm3, %v794_v56 }
  0x9c   : > { %v199_v34 = vpop.permute.xlu1 %198 }
  0xa1   : > { %v340_v35 = vpop.permute.xlu1 %339 }
  0xa5   : > { %v335_v36 = vpop.permute.xlu1 %334 }
  0xa9   : > { %v330_v37 = vpop.permute.xlu1 %329 }
  0xad   : > { %v325_v38 = vpop.permute.xlu1 %324 }
  0xb2   : > { %v522_v39 = vpop.permute.xlu1 %521 }
  0xb3   : > { %v524_v41 = vmul.f32 %v522_v39, %v176_v32 }
  0xb7   : > { %v444_v40 = vpop.permute.xlu1 %443 }
  0xbc   : > { %v527_v42 = vpop.permute.xlu1 %526 }
  0xbd   : > { %v529_v43 = vadd.f32 %v527_v42, %v524_v41 }
  0xbf   : > { %530 = vst [vmem:[%s939_s29] sm:$0xf] %v529_v43 }
 0x156   : > { %v648_v44 = vpop.f32.mrf.mxu0 }
 0x157   : > { %v301_v49 = vadd.f32 %v648_v44, %v204_v33 }
 0x158   : > { %v295_v45 = vpop.f32.mrf.mxu0 }
 0x159   : > { %v296_v52 = vadd.f32 %v295_v45, %v199_v34  ;;  %v315_v54 = vmax.f32 %v301_v49, 0.0 }
 0x15a   : > { %v651_v46 = vpop.f32.mrf.mxu0 }
 0x15b   : > { %v311_v47 = vadd.f32 %v651_v46, %v214_v30  ;;  %v314_v55 = vmax.f32 %v296_v52, 0.0 }
 0x15c   : > { %v305_v48 = vpop.f32.mrf.mxu0 }
 0x15d   : > { %v317_v50 = vmax.f32 %v311_v47, 0.0  ;;  %v306_v51 = vadd.f32 %v305_v48, %v209_v31 }
 0x15f   : > { %v316_v53 = vmax.f32 %v306_v51, 0.0  ;;  %652 = vmatprep.subr.mxu1 %v317_v50 }
 0x160   : > { %653 = vmatpush3.msra.mxu1 %v317_v50 }
 0x161   : > { %654 = vmatprep.subr.mxu1 %v316_v53 }
 0x162   : > { %655 = vmatpush3.msra.mxu1 %v316_v53 }
 0x163   : > { %656 = vmatprep.subr.mxu1 %v315_v54 }
 0x164   : > { %657 = vmatpush3.msra.mxu1 %v315_v54 }
 0x165   : > { %658 = vmatprep.subr.mxu1 %v314_v55 }
 0x166   : > { %659 = vmatpush3.msra.mxu1 %v314_v55 }
 0x167   : > { %661 = vmatmul.mubr.msk.f32.vlgmr.msra.gmra.mxu1 %vm342_vm2, %v905_v13 }
 0x168   : > { %663 = vmatprep.mubr.msk.f32.mxu1 %vm342_vm2, %v898_v11 }
 0x16b   : > { %664 = vmatmul.mubr.msk.f32.gmra.mxu1 %vm342_vm2, %v891_v8 }
 0x227   : > { %v662_v57 = vpop.f32.mrf.mxu1 }
 0x228   : > { %v423_v62 = vadd.f32 %v662_v57, %v330_v37 }
 0x229   : > { %v417_v58 = vpop.f32.mrf.mxu1 }
 0x22a   : > { %v418_v1 = vadd.f32 %v417_v58, %v325_v38  ;;  %v437_v3 = vmax.f32 %v423_v62, 0.0 }
 0x22b   : > { %v665_v59 = vpop.f32.mrf.mxu1 }
 0x22c   : > { %v433_v60 = vadd.f32 %v665_v59, %v340_v35  ;;  %v436_v4 = vmax.f32 %v418_v1, 0.0 }
 0x22d   : > { %v427_v61 = vpop.f32.mrf.mxu1 }
 0x22e   : > { %v439_v63 = vmax.f32 %v433_v60, 0.0  ;;  %v428_v0 = vadd.f32 %v427_v61, %v335_v36 }
 0x230   : > { %v438_v2 = vmax.f32 %v428_v0, 0.0  ;;  %667 = vmatpush3.msra.mxu0 %v439_v63 }
 0x231   : > { %668 = vmatprep.subr.mxu0 %v794_v56 }
 0x232   : > { %669 = vmatpush3.msra.mxu0 %v438_v2 }
 0x233   : > { %670 = vmatprep.subr.mxu0 %v794_v56 }
 0x234   : > { %671 = vmatpush3.msra.mxu0 %v437_v3 }
 0x235   : > { %672 = vmatprep.subr.mxu0 %v794_v56 }
 0x236   : > { %673 = vmatpush3.msra.mxu0 %v436_v4 }
 0x237   : > { %675 = vmatmul.mubr.msk.f32.vlgmr.msra.gmra.mxu0 %vm342_vm2, %v921_v21 }
 0x2f7   : > { %v514_v5 = vpop.f32.mrf.mxu0 }
 0x2f8   : > { %v515_v6 = vadd.f32 %v514_v5, %v444_v40 }
 0x2f9   : > { %v676_v7 = vpop.f32.mrf.mxu0 }
 0x2fa   : > { %531 = vst [vmem:[%s939_s29 + $0x4] sm:$0x7] %v515_v6 }
 0x2fb   : > { %741 = shalt.err (!%p738_p3)
}
 0x2fc   : > { %s742_s17 = scalar_lea.hbm %s956_s6, 128  ;;  %s746_s23 = scalar_lea.hbm %s996_s2, 256 }
 0x2fd   : > { %p743_p4 = scmp.ne.s32.totalorder %s956_s6, %s742_s17  ;;  %p747_p9 = scmp.lt.s32.totalorder %s956_s6, %s996_s2 }
 0x2fe   : > { %p748_p10 = scmp.lt.s32.totalorder %s746_s23, %s742_s17 }
 0x2ff   : > { %p744_p7 = pnand %p743_p4, %p850_p5 }
 0x300   : > { %p749_p11 = por %p748_p10, %p747_p9 }
 0x301   : > { %p745_p8 = pneg %p744_p7 }
 0x303   : > { %p750_p12 = pnand %p749_p11, %p745_p8 }
 0x305   : > { %753 = shalt.err (!%p750_p12)
}
 0x306   : > { %677 = dma.vmem_to_hbm [thread:$0]  (%p850_p5), %s547_s3, 128, %s956_s6, %s533_s7  }
 0x307 PF: > { %p683_p13 = scmp.ge.s32.totalorder %s788_s12, 2  ;;  %s558_s26 = sand.u32 1, %s776_s9  }
 0x308   : > { %s559_s27 = scalar_lea.sflag [#allocation3], %s558_s26 }
 0x309   : > { %p680_p0 = pnand %p683_p13, %p854_p6 }
 0x30b   : > { %p681_p1 = pneg %p680_p0 }
 0x30d   : > { %771 = dma.done.wait (%p681_p1), %s559_s27, 128  }
 0x30e   : > { %773 = vsyncadd (%p681_p1), %s559_s27, 4294967168  ;;  %p12_p2 = scmp.ge.s32.totalorder %s837_s15, 4   ;;  %s999_s9 = smov %s780_s10 }
 0x30f   : > { %s1000_s10 = smov %s784_s11  ;;  %s1001_s11 = smov %s848_s18 }
 0x310   : > { %s1002_s12 = smov %s837_s15  ;;  %14 = sbr.rel (!%p12_p2) target bundleno = 3 (0x3), region = 63 }
 0x315   :  { %564 = vsyncpa [#allocation3], 1 }
 0x316   :  { %566 = vsyncpa [#allocation3 + $0x1], 1 }

</bundles_post_ra>
